<compile_context>
chip_gen: v5e
topology: v5e:2x2
jax: 0.10.0
libtpu: 0.0.40
codegen_flags: <defaults>
</compile_context>

<pallas_src>
import functools

import jax
import jax.numpy as jnp
from jax.experimental import pallas as pl
from jax.experimental.pallas import tpu as pltpu

LANES = 128
SUBLANES = 8
ACC_ROWS_MAX = 64                        # (64, 128) f32 accumulator = 32 KiB
TARGET_BLOCK_BYTES = 4 * 1024 * 1024     # ~4 MiB input block, double-buffered


def _ganloss_gen_kernel(dg_ref, out_ref, *, tile_rows, acc_rows, n_rows,
                        has_overhang):
    t = pl.program_id(0)

    @pl.when(t == 0)
    def _():
        out_ref[...] = jnp.zeros_like(out_ref)

    # Widen in-kernel: HBM traffic stays at the input's native width.
    d = dg_ref[...].astype(jnp.float32) - 1.0
    dd = d * d

    def reduce_into_acc(vals):
        # acc_rows/8 independent vreg add chains -> VALU ILP, no long serial chain.
        out_ref[...] += vals.reshape(tile_rows // acc_rows, acc_rows, LANES).sum(axis=0)

    if has_overhang:
        is_boundary = t == pl.num_programs(0) - 1

        @pl.when(is_boundary)
        def _():
            # Mask by LOGICAL row index (rows >= n_rows), independent of whatever
            # data the clamped boundary DMA happened to read.
            row0 = t * tile_rows
            rows = jax.lax.broadcasted_iota(jnp.int32, (tile_rows, LANES), 0) + row0
            reduce_into_acc(jnp.where(rows < n_rows, dd, 0.0))

        @pl.when(jnp.logical_not(is_boundary))
        def _():
            reduce_into_acc(dd)
    else:
        reduce_into_acc(dd)


def gan_loss_gen(dg: jax.Array) -> jax.Array:
    """0.5 * mean((dg - 1)^2) computed in a Pallas TPU kernel. Returns f32 scalar."""
    n_valid = dg.size
    if n_valid == 0:
        # torch.mean of an empty tensor is NaN; avoid a 0-size pallas_call.
        return jnp.float32(jnp.nan)

    flat = dg.reshape(-1)                      # free reshape; keep native dtype
    itemsize = dg.dtype.itemsize

    # Largest (8*128)-aligned prefix goes through the kernel; the <1024-element
    # tail is folded into the epilogue (no pad / concatenate copy).
    kernel_len = (n_valid // (SUBLANES * LANES)) * (SUBLANES * LANES)

    total = jnp.float32(0.0)

    if kernel_len > 0:
        n_rows = kernel_len // LANES           # multiple of 8
        flat_main = flat if kernel_len == n_valid else flat[:kernel_len]
        slab = flat_main.reshape(n_rows, LANES)

        # Byte-sized blocks: ~4 MiB regardless of dtype (8192 rows f32,
        # 16384 rows bf16); always a multiple of ACC_ROWS_MAX.
        tile_rows_max = max(
            ACC_ROWS_MAX,
            (TARGET_BLOCK_BYTES // (LANES * itemsize)) // ACC_ROWS_MAX * ACC_ROWS_MAX)
        tile_rows = min(n_rows, tile_rows_max)

        # Accumulator rows: largest power-of-two divisor of tile_rows, <= 64.
        acc_rows = ACC_ROWS_MAX
        while tile_rows % acc_rows != 0:
            acc_rows //= 2                     # tile_rows is a multiple of 8

        num_tiles = pl.cdiv(n_rows, tile_rows)
        has_overhang = (n_rows % tile_rows) != 0

        kernel = functools.partial(
            _ganloss_gen_kernel,
            tile_rows=tile_rows,
            acc_rows=acc_rows,
            n_rows=n_rows,
            has_overhang=has_overhang,
        )

        partials = pl.pallas_call(
            kernel,
            out_shape=jax.ShapeDtypeStruct((acc_rows, LANES), jnp.float32),
            grid_spec=pltpu.PrefetchScalarGridSpec(
                num_scalar_prefetch=0,
                grid=(num_tiles,),
                in_specs=[pl.BlockSpec((tile_rows, LANES), lambda t: (t, 0))],
                out_specs=pl.BlockSpec((acc_rows, LANES), lambda t: (0, 0)),
            ),
            compiler_params=pltpu.CompilerParams(
                dimension_semantics=("arbitrary",),
                vmem_limit_bytes=32 * 1024 * 1024,
            ),
            cost_estimate=pl.CostEstimate(
                flops=3 * kernel_len,
                transcendentals=0,
                bytes_accessed=kernel_len * itemsize + acc_rows * LANES * 4,
            ),
        )(slab)
        total = total + jnp.sum(partials)

    if kernel_len != n_valid:
        # < 1024 leftover elements: one tiny fused XLA reduce, still 1x HBM traffic.
        tail = flat[kernel_len:].astype(jnp.float32) - 1.0
        total = total + jnp.sum(tail * tail)

    # 0.5 / N baked as a static f32 constant (avoids f32(N) rounding for huge N).
    return total * jnp.float32(0.5 / float(n_valid))


if __name__ == "__main__":
    key = jax.random.PRNGKey(0)
    # Discriminator output on generated samples (NCHW-like), small shape.
    dg = jax.random.normal(key, (2, 4, 16, 16), dtype=jnp.float32)

    loss = jax.block_until_ready(jax.jit(gan_loss_gen)(dg))

    # Reference check (plain JAX, mirrors the PyTorch forward).
    ref = 0.5 * jnp.mean((dg.astype(jnp.float32) - 1.0) ** 2)
    assert jnp.allclose(loss, ref, rtol=1e-5, atol=1e-6), (loss, ref)

    print("KERNEL_OK")
</pallas_src>

<mosaic_0001>
module attributes {stable_mosaic.version = 11 : i64} {
  func.func @_ganloss_gen_kernel(%arg0: i32, %arg1: memref<16x128xf32, #tpu.memory_space<vmem>>, %arg2: memref<16x128xf32, #tpu.memory_space<vmem>>) attributes {dimension_semantics = [#tpu.dimension_semantics<arbitrary>], iteration_bounds = array<i64: 1>, scalar_prefetch = 0 : i64, scratch_operands = 0 : i64, tpu.core_type = #tpu.core_type<tc>, window_params = [{transform_indices = @transform_0, window_bounds = array<i64: 16, 128>}, {pipeline_mode = #tpu.pipeline_mode<synchronous>, transform_indices = @transform_1, window_bounds = array<i64: 16, 128>}]} {
    %c0_i32 = arith.constant 0 : i32
    %0 = arith.cmpi eq, %arg0, %c0_i32 : i32
    %1 = arith.extui %0 : i1 to i32
    %c0_i32_0 = arith.constant 0 : i32
    %2 = arith.cmpi ne, %1, %c0_i32_0 : i32
    scf.if %2 {
      %cst_7 = arith.constant 0.000000e+00 : f32
      %12 = vector.broadcast %cst_7 : f32 to vector<16x128xf32>
      %c0_8 = arith.constant 0 : index
      %c0_9 = arith.constant 0 : index
      %13 = vector.load %arg2[%c0_8, %c0_9] : memref<16x128xf32, #tpu.memory_space<vmem>>, vector<16x128xf32>
      tpu.vector_store %arg2[%c0_8, %c0_9], %12 {strides = array<i32>} : memref<16x128xf32, #tpu.memory_space<vmem>>, vector<16x128xf32>,
    } else {
    }
    %c0 = arith.constant 0 : index
    %c0_1 = arith.constant 0 : index
    %3 = vector.load %arg1[%c0, %c0_1] : memref<16x128xf32, #tpu.memory_space<vmem>>, vector<16x128xf32>
    %cst = arith.constant 1.000000e+00 : f32
    %4 = vector.broadcast %cst : f32 to vector<16x128xf32>
    %5 = arith.subf %3, %4 : vector<16x128xf32>
    %6 = arith.mulf %5, %5 : vector<16x128xf32>
    %c0_2 = arith.constant 0 : index
    %c0_3 = arith.constant 0 : index
    %7 = vector.load %arg2[%c0_2, %c0_3] : memref<16x128xf32, #tpu.memory_space<vmem>>, vector<16x128xf32>
    %8 = vector.shape_cast %6 : vector<16x128xf32> to vector<1x16x128xf32>
    %cst_4 = arith.constant dense<0.000000e+00> : vector<16x128xf32>
    %9 = vector.multi_reduction <add>, %8, %cst_4 [0] : vector<1x16x128xf32> to vector<16x128xf32>
    %10 = arith.addf %7, %9 : vector<16x128xf32>
    %c0_5 = arith.constant 0 : index
    %c0_6 = arith.constant 0 : index
    %11 = vector.load %arg2[%c0_5, %c0_6] : memref<16x128xf32, #tpu.memory_space<vmem>>, vector<16x128xf32>
    tpu.vector_store %arg2[%c0_5, %c0_6], %10 {strides = array<i32>} : memref<16x128xf32, #tpu.memory_space<vmem>>, vector<16x128xf32>,
    return
  }
  func.func @transform_0(%arg0: i32) -> (i32, i32) {
    %c0_i32 = arith.constant 0 : i32
    %c0_i32_0 = arith.constant 0 : i32
    return %arg0, %c0_i32 : i32, i32
  }
  func.func @transform_1(%arg0: i32) -> (i32, i32) {
    %c0_i32 = arith.constant 0 : i32
    %c0_i32_0 = arith.constant 0 : i32
    %c0_i32_1 = arith.constant 0 : i32
    return %c0_i32, %c0_i32_0 : i32, i32
  }
}

</mosaic_0001>

<bundles_post_ra>
// kernel: gan_loss_gen.1
= control target key start
LH: loop header
LB: loop body
LE: loop exit
PB: predicated region body
PF: predicated region fallthrough
CT: control target
= control target key end

     0   :  { %s57_s0 = inlined_call_operand.vmem [shape: f32[16,128], index: 0, kind: input, shape index: {}]   ;;  %s58_s1 = inlined_call_operand.vmem [shape: f32[16,128], index: 1, kind: output, shape index: {}]  }
   0x1   :  { %v14_v0 = vld [vmem:[%s57_s0] sm:$0xff]  ;;  %v15_v1 = vld [vmem:[%s57_s0 + $0x8] sm:$0xff] }
   0x2   :  { %v32_v2 = vadd.f32 -1.0, %v14_v0  ;;  %v33_v3 = vadd.f32 -1.0, %v15_v1 }
   0x4   :  { %v18_v4 = vmul.f32 %v32_v2, %v32_v2  ;;  %v19_v5 = vmul.f32 %v33_v3, %v33_v3 }
   0x6   :  { %26 = vst [vmem:[%s58_s1] sm:$0xff] %v18_v4 }
   0x7   :  { %27 = vst [vmem:[%s58_s1 + $0x8] sm:$0xff] %v19_v5 }

</bundles_post_ra>
